<compile_context>
chip_gen: v7x
topology: tpu7x:2x2x1
jax: 0.10.0
libtpu: 0.0.40
codegen_flags: <defaults>
</compile_context>

<pallas_src>
import jax
import jax.numpy as jnp
from jax.experimental import pallas as pl
from jax.experimental.pallas import tpu as pltpu


def _innerprod_kernel(bias_ref, w_ref, snd_ref, out_ref):
    # bias_ref: (1,)          SMEM scalar
    # w_ref   : (TB, 1, C)    VMEM  -- feat_img * scale, fused in the wrapper
    # snd_ref : (TB, C, THW)  VMEM  -- native HBM dtype (no up-cast in wrapper)
    # out_ref : (TB, 1, THW)  VMEM
    snd = snd_ref[...]
    w = w_ref[...].astype(snd.dtype)                      # match MXU operand dtype
    z = jnp.einsum("bxc,bcs->bxs", w, snd,
                   preferred_element_type=jnp.float32)    # (TB, 1, THW), f32 accum
    out_ref[...] = (z + bias_ref[0]).astype(out_ref.dtype)


def _default_tile_budget():
    """Per-block byte budget for the (double-buffered) feat_sound tile.

    Conservative enough for v5e's 16 MiB and v7x's 32 MiB scoped-VMEM defaults
    (2 x 6 MiB + small buffers); larger on v6e (128 MiB physical VMEM).
    """
    try:
        kind = jax.devices()[0].device_kind.lower()
    except Exception:
        return 4 << 20
    if "v6" in kind:
        return 10 << 20
    return 6 << 20


def _choose_tiles(B, C, HW, itemsize, budget):
    """Pick (TB, THW) so a (TB, C, THW) feat_sound block is ~budget bytes."""
    row_bytes = max(1, C * itemsize)                 # bytes per spatial lane
    lane_cap = max(128, (budget // row_bytes) // 128 * 128)
    if HW <= lane_cap:
        # Whole spatial extent fits one block (block last dim == full dim, so no
        # 128-alignment needed).  Amortize per-step overhead over the batch axis.
        thw = HW
        per_batch = max(1, C * thw * itemsize)
        tb = int(max(1, min(B, budget // per_batch)))
    else:
        thw = lane_cap                               # 128-multiple, lane-dense
        tb = 1
    return tb, thw


def inner_prod(feat_img, feat_sound, scale, bias, *, tile_budget_bytes=None):
    """feat_img: (B, C), feat_sound: (B, C, H, W), scale: (C,), bias: (1,)."""
    B, C, H, W = feat_sound.shape
    HW = H * W

    out_dtype = jnp.result_type(feat_img.dtype, feat_sound.dtype,
                                scale.dtype, bias.dtype)
    budget = (tile_budget_bytes if tile_budget_bytes is not None
              else _default_tile_budget())
    itemsize = jnp.dtype(feat_sound.dtype).itemsize
    TB, THW = _choose_tiles(B, C, HW, itemsize, budget)

    n_b = pl.cdiv(B, TB)
    n_sp = pl.cdiv(HW, THW)

    # Fold scale into the per-batch weights (tiny op, keeps the product in f32).
    w3 = (feat_img * scale.reshape(1, C)).reshape(B, 1, C)
    snd3 = feat_sound.reshape(B, C, HW)              # no dtype up-cast, no pad
    bias1 = bias.reshape(1).astype(jnp.float32)

    # Put the longer (parallel) axis first so megacore sharding sees it.
    if n_b >= n_sp:
        grid = (n_b, n_sp)
        bsel = lambda i, j: i
        tsel = lambda i, j: j
    else:
        grid = (n_sp, n_b)
        bsel = lambda i, j: j
        tsel = lambda i, j: i

    out = pl.pallas_call(
        _innerprod_kernel,
        out_shape=jax.ShapeDtypeStruct((B, 1, HW), out_dtype),
        grid=grid,
        in_specs=[
            # bias scalar in SMEM (shared across all grid steps)
            pl.BlockSpec(memory_space=pltpu.SMEM),
            # (feat_img * scale)[b-block] -> kernel sees (TB, 1, C)
            pl.BlockSpec((TB, 1, C), lambda i, j: (bsel(i, j), 0, 0)),
            # feat_sound[b-block, :, spatial tile] -> kernel sees (TB, C, THW)
            pl.BlockSpec((TB, C, THW), lambda i, j: (bsel(i, j), 0, tsel(i, j))),
        ],
        out_specs=pl.BlockSpec((TB, 1, THW),
                               lambda i, j: (bsel(i, j), 0, tsel(i, j))),
        compiler_params=pltpu.CompilerParams(
            dimension_semantics=("parallel", "parallel")),
    )(bias1, w3, snd3)

    return out.reshape(B, 1, H, W)


def inner_prod_ref(feat_img, feat_sound, scale, bias):
    # Pure-JAX reference mirroring the PyTorch forward.
    B, C, H, W = feat_sound.shape
    img = feat_img.reshape(B, 1, C) * scale.reshape(1, 1, C)
    z = jnp.einsum("boc,bcs->bos", img,
                   feat_sound.reshape(B, C, H * W).astype(img.dtype))
    return z.reshape(B, 1, H, W) + bias.reshape(())


def _check(z, z_ref, shape):
    assert z.shape == shape, (z.shape, shape)
    assert jnp.allclose(z, z_ref, atol=1e-4, rtol=1e-4), float(
        jnp.max(jnp.abs(z - z_ref)))


if __name__ == "__main__":
    key = jax.random.PRNGKey(0)
    k1, k2, k3, k4, k5, k6, k7, k8 = jax.random.split(key, 8)

    # Parameter init matching nn.Parameter defaults in __init__:
    #   scale = torch.ones(fc_dim), bias = torch.zeros(1)
    B, C, H, W = 2, 4, 16, 16
    scale = jnp.ones((C,), dtype=jnp.float32)
    bias = jnp.zeros((1,), dtype=jnp.float32)

    feat_img = jax.random.normal(k1, (B, C), dtype=jnp.float32)
    feat_sound = jax.random.normal(k2, (B, C, H, W), dtype=jnp.float32)
    z = inner_prod(feat_img, feat_sound, scale, bias)
    jax.block_until_ready(z)
    _check(z, inner_prod_ref(feat_img, feat_sound, scale, bias), (B, 1, H, W))

    # Non-128-multiple spatial size (single full-extent spatial block).
    H2, W2 = 10, 10
    feat_img2 = jax.random.normal(k3, (B, C), dtype=jnp.float32)
    feat_sound2 = jax.random.normal(k4, (B, C, H2, W2), dtype=jnp.float32)
    z2 = inner_prod(feat_img2, feat_sound2, scale, bias)
    jax.block_until_ready(z2)
    _check(z2, inner_prod_ref(feat_img2, feat_sound2, scale, bias), (B, 1, H2, W2))

    # Force multi-tile spatial path with a ragged (masked) last tile.
    B3, C3, H3, W3 = 2, 8, 48, 48
    scale3 = jax.random.normal(k5, (C3,), dtype=jnp.float32)
    bias3 = jnp.float32(0.5) * jnp.ones((1,), dtype=jnp.float32)
    feat_img3 = jax.random.normal(k6, (B3, C3), dtype=jnp.float32)
    feat_sound3 = jax.random.normal(k7, (B3, C3, H3, W3), dtype=jnp.float32)
    z3 = inner_prod(feat_img3, feat_sound3, scale3, bias3,
                    tile_budget_bytes=64 << 10)
    jax.block_until_ready(z3)
    _check(z3, inner_prod_ref(feat_img3, feat_sound3, scale3, bias3),
           (B3, 1, H3, W3))

    # Force batch-blocking with a ragged (masked) last batch block.
    B4, C4, H4, W4 = 5, 8, 16, 16
    scale4 = jnp.ones((C4,), dtype=jnp.float32)
    bias4 = jnp.zeros((1,), dtype=jnp.float32)
    feat_img4 = jax.random.normal(k8, (B4, C4), dtype=jnp.float32)
    feat_sound4 = jax.random.normal(k1, (B4, C4, H4, W4), dtype=jnp.float32)
    z4 = inner_prod(feat_img4, feat_sound4, scale4, bias4,
                    tile_budget_bytes=20 << 10)
    jax.block_until_ready(z4)
    _check(z4, inner_prod_ref(feat_img4, feat_sound4, scale4, bias4),
           (B4, 1, H4, W4))

    print("KERNEL_OK")
</pallas_src>

<mosaic_0001>
module attributes {stable_mosaic.version = 11 : i64} {
  func.func @_innerprod_kernel(%arg0: i32, %arg1: i32, %arg2: memref<1xf32, #tpu.memory_space<smem>>, %arg3: memref<2x1x4xf32, #tpu.memory_space<vmem>>, %arg4: memref<2x4x256xf32, #tpu.memory_space<vmem>>, %arg5: memref<2x1x256xf32, #tpu.memory_space<vmem>>) attributes {dimension_semantics = [#tpu.dimension_semantics<parallel>, #tpu.dimension_semantics<parallel>], iteration_bounds = array<i64: 1, 1>, scalar_prefetch = 0 : i64, scratch_operands = 0 : i64, tpu.core_type = #tpu.core_type<tc>, window_params = [{transform_indices = @transform_0, window_bounds = array<i64: 1>}, {transform_indices = @transform_1, window_bounds = array<i64: 2, 1, 4>}, {transform_indices = @transform_2, window_bounds = array<i64: 2, 4, 256>}, {transform_indices = @transform_3, window_bounds = array<i64: 2, 1, 256>}]} {
    %c0 = arith.constant 0 : index
    %c0_0 = arith.constant 0 : index
    %c0_1 = arith.constant 0 : index
    %0 = vector.load %arg4[%c0, %c0_0, %c0_1] : memref<2x4x256xf32, #tpu.memory_space<vmem>>, vector<2x4x256xf32>
    %c0_2 = arith.constant 0 : index
    %c0_3 = arith.constant 0 : index
    %c0_4 = arith.constant 0 : index
    %1 = vector.load %arg3[%c0_2, %c0_3, %c0_4] : memref<2x1x4xf32, #tpu.memory_space<vmem>>, vector<2x1x4xf32>
    "tpu.trace_start"() <{level = 10 : i32, message = "bxc,bcs->bxs"}> : () -> ()
    %cst = arith.constant dense<0.000000e+00> : vector<2x1x256xf32>
    %2 = tpu.matmul %1, %0, %cst {dimension_numbers = #tpu.dot_dimension_numbers<[2], [1], [1], [2], [0, 0, 0, 1, 1, 2], [0], [0]>} : vector<2x1x4xf32>, vector<2x4x256xf32>, vector<2x1x256xf32> -> vector<2x1x256xf32>
    "tpu.trace_stop"() : () -> ()
    %c0_5 = arith.constant 0 : index
    %3 = memref.load %arg2[%c0_5] : memref<1xf32, #tpu.memory_space<smem>>
    %4 = vector.broadcast %3 : f32 to vector<2x1x256xf32>
    %5 = arith.addf %2, %4 : vector<2x1x256xf32>
    %c0_6 = arith.constant 0 : index
    %c0_7 = arith.constant 0 : index
    %c0_8 = arith.constant 0 : index
    %6 = vector.load %arg5[%c0_6, %c0_7, %c0_8] : memref<2x1x256xf32, #tpu.memory_space<vmem>>, vector<2x1x256xf32>
    tpu.vector_store %arg5[%c0_6, %c0_7, %c0_8], %5 {strides = array<i32>} : memref<2x1x256xf32, #tpu.memory_space<vmem>>, vector<2x1x256xf32>,
    return
  }
  func.func @transform_0(%arg0: i32, %arg1: i32) -> i32 {
    %c0_i32 = arith.constant 0 : i32
    %c0_i32_0 = arith.constant 0 : i32
    return %c0_i32 : i32
  }
  func.func @transform_1(%arg0: i32, %arg1: i32) -> (i32, i32, i32) {
    %c0_i32 = arith.constant 0 : i32
    %c0_i32_0 = arith.constant 0 : i32
    %c0_i32_1 = arith.constant 0 : i32
    return %arg0, %c0_i32, %c0_i32_0 : i32, i32, i32
  }
  func.func @transform_2(%arg0: i32, %arg1: i32) -> (i32, i32, i32) {
    %c0_i32 = arith.constant 0 : i32
    %c0_i32_0 = arith.constant 0 : i32
    return %arg0, %c0_i32, %arg1 : i32, i32, i32
  }
  func.func @transform_3(%arg0: i32, %arg1: i32) -> (i32, i32, i32) {
    %c0_i32 = arith.constant 0 : i32
    %c0_i32_0 = arith.constant 0 : i32
    return %arg0, %c0_i32, %arg1 : i32, i32, i32
  }
}

</mosaic_0001>

<bundles_post_ra>
// kernel: tpu_custom_call.1
= control target key start
LH: loop header
LB: loop body
LE: loop exit
PB: predicated region body
PF: predicated region fallthrough
CT: control target
= control target key end

     0   :  { %9 = vsyncpa [#allocation4], 0  ;;  %s382_s0 = inlined_call_operand.<no memory space> [shape: f32[1], index: 0, kind: input, shape index: {}]   ;;  %s383_s1 = inlined_call_operand.vmem [shape: f32[2,1,4], index: 1, kind: input, shape index: {}]   ;;  %s384_s2 = inlined_call_operand.hbm [shape: f32[2,4,256], index: 2, kind: input, shape index: {}]   ;;  %s385_s3 = inlined_call_operand.hbm [shape: f32[2,1,256], index: 3, kind: output, shape index: {}]  }
   0x1   :  { %10 = vsyncpa [#allocation5], 0  ;;  %s321_s12 = smov [#allocation3]   ;;  %s273_s16 = scalar_lea.hbm %s384_s2, 256 }
   0x2   :  { %s20_s13 = sshll.u32 %s321_s12, 4  ;;  %p274_p0 = scmp.ne.s32.totalorder %s384_s2, %s273_s16  ;;  %s21_s13 = int_to_ptr.vmem [resolvable:$true] %s20_s13 }
   0x3   :  { %p277_p1 = scmp.lt.u32.totalorder %s273_s16, %s384_s2 }
   0x5   :  { %p279_p2 = pnand %p277_p1, %p274_p0 }
   0x7   :  { %282 = shalt.err (!%p279_p2)
}
   0x8   :  { %s283_s21 = scalar_lea.vmem %s21_s13, 256  ;;  %p288_p4 = scmp.lt.s32.totalorder %s21_s13, %s21_s13 }
   0x9   :  { %p284_p3 = scmp.ne.s32.totalorder %s21_s13, %s283_s21  ;;  %p289_p5 = scmp.lt.s32.totalorder %s283_s21, %s283_s21 }
   0xb   :  { %p290_p6 = por %p289_p5, %p288_p4 }
   0xd   :  { %p291_p7 = pnand %p290_p6, %p284_p3 }
   0xf   :  { %294 = shalt.err (!%p291_p7)
}
  0x10   :  { %s322_s22 = smov 128   ;;  %s323_s23 = smov 8  }
  0x11   :  { %26 = dma.hbm_to_vmem [thread:$0]  %s384_s2, 256, %s21_s13, [#allocation4], %s322_s22, %s322_s22, %s323_s23  }
  0x12   :  { %317 = dma.done.wait [#allocation4], 256  }
  0x13   :  { %318 = vsyncadd [#allocation4], 4294967040  ;;  %v324_v0 = vmov 0.0   ;;  %v30_v1 = vld [vmem:[#allocation3] sm:$0xff]  ;;  %vm42_vm0 = vcmask 1043456   ;;  %v31_v2 = vld [vmem:[#allocation3 + $0x8] sm:$0xff]  ;;  %v206_v9 = vlaneseq  ;;  %v35_v10 = vstv %s382_s0 }
  0x14   :  { %111 = vmatprep.mubr.f32.mxu0 %v324_v0  ;;  %191 = vmatprep.mubr.f32.mxu1 %v324_v0  ;;  %v37_v3 = vcombine.high %v30_v1, %v30_v1  ;;  %v119_v4 = vcombine.high %v31_v2, %v31_v2  ;;  %v32_v5 = vld [vmem:[%s383_s1] sm:$0x1]  ;;  %vm38_vm1 = vcmask 31744   ;;  %v33_v6 = vld [vmem:[%s383_s1 + $0x1] sm:$0x1]  ;;  %s326_s1 = smov [#allocation6]  }
  0x15   :  { %v325_v7 = vmov 1966171168   ;;  %v207_v12 = vshrl.u32 %v206_v9, 7  ;;  %s245_s4 = sshll.u32 %s326_s1, 4  ;;  %vm236_vm2 = vcmp.lt.s32.totalorder %v206_v9, 256  ;;  %s246_s4 = int_to_ptr.vmem [resolvable:$true] %s245_s4 }
  0x16   :  { %257 = vmatprep.subr.msk.mxu0 %vm42_vm0, %v37_v3  ;;  %260 = vmatprep.subr.msk.mxu1 %vm42_vm0, %v119_v4  ;;  %v204_v8 = vunpack.c.l.s4 %v325_v7  ;;  %s295_s0 = scalar_lea.vmem %s246_s4, 64  ;;  %p300_p9 = scmp.lt.s32.totalorder %s246_s4, %s246_s4 }
  0x17   :  { %258 = vmatpush1.msk.msra.mxu0 %vm42_vm0, %v30_v1  ;;  %261 = vmatpush1.msk.msra.mxu1 %vm42_vm0, %v31_v2  ;;  %p296_p8 = scmp.ne.s32.totalorder %s246_s4, %s295_s0  ;;  %p301_p10 = scmp.lt.s32.totalorder %s295_s0, %s295_s0 }
  0x18   :  { %259 = vmatmul.mubr.msk.f32.vlgmr.msra.gmra.mrb[0].mxu0 %vm38_vm1, %v32_v5  ;;  %262 = vmatmul.mubr.msk.f32.vlgmr.msra.gmra.mrb[0].mxu1 %vm38_vm1, %v33_v6  ;;  %v205_v11 = vunpack.c.0.s8 %v204_v8 }
  0x19   :  { %p302_p11 = por %p301_p10, %p300_p9 }
  0x1a   :  { %v208_v20 = vsub.s32 %v205_v11, %v207_v12 }
  0x1b   :  { %p303_p12 = pnand %p302_p11, %p296_p8 }
  0xeb   :  { %v113_v13 = vpop.f32.mrb[0].mxu0  ;;  %v193_v14 = vpop.f32.mrb[0].mxu1 }
  0xec   :  { %v114_v15 = vadd.f32 %v113_v13, %v35_v10  ;;  %v194_v16 = vadd.f32 %v193_v14, %v35_v10  ;;  %v115_v17 = vpop.f32.mrb[1].mxu0  ;;  %v195_v18 = vpop.f32.mrb[1].mxu1 }
  0xed   :  { %v116_v19 = vadd.f32 %v115_v17, %v35_v10  ;;  %v196_v21 = vadd.f32 %v195_v18, %v35_v10 }
  0xef   :  { %v202_v22 = vcombine.low %v114_v15, %v116_v19  ;;  %v217_v23 = vcombine.low %v194_v16, %v196_v21 }
  0xf1   :  { %v209_v24 = vrot.slane %v202_v22, %v208_v20  ;;  %v224_v25 = vrot.slane %v217_v23, %v208_v20 }
  0xf3   :  { %v216_v26 = vrot.slane %v209_v24, %v208_v20  ;;  %v231_v27 = vrot.slane %v224_v25, %v208_v20 }
  0xf5   :  { %238 = vst.msk [vmem:[#allocation6] sm:$0x3] %vm236_vm2, %v216_v26  ;;  %239 = vst.msk [vmem:[#allocation6 + $0x2] sm:$0x3] %vm236_vm2, %v231_v27 }
  0xf6   :  { %306 = shalt.err (!%p303_p12)
}
  0xf7   :  { %s307_s7 = scalar_lea.hbm %s385_s3, 64 }
  0xf8   :  { %p308_p13 = scmp.ne.s32.totalorder %s385_s3, %s307_s7  ;;  %p311_p0 = scmp.lt.u32.totalorder %s307_s7, %s385_s3 }
  0xfa   :  { %p313_p1 = pnand %p311_p0, %p308_p13 }
  0xfc   :  { %316 = shalt.err (!%p313_p1)
}
  0xfd   :  { %s327_s12 = smov 32   ;;  %s328_s13 = smov 2  }
  0xfe   :  { %251 = dma.vmem_to_hbm [thread:$0]  %s246_s4, 64, %s385_s3, [#allocation5], %s327_s12, %s327_s12, %s328_s13  }
  0xff   :  { %319 = dma.done.wait [#allocation5], 64  }
 0x100   :  { %320 = vsyncadd [#allocation5], 4294967232 }
 0x101   :  { %255 = vsyncpa [#allocation4], 1 }
 0x102   :  { %256 = vsyncpa [#allocation5], 1 }

</bundles_post_ra>
